<compile_context>
chip_gen: v7x
topology: tpu7x:2x2x1
jax: 0.10.0
libtpu: 0.0.40
codegen_flags: <defaults>
</compile_context>

<pallas_src>
import jax
import jax.numpy as jnp
from jax.experimental import pallas as pl
from jax.experimental.pallas import tpu as pltpu


def _eltwise_kernel(x_ref, w1_ref, w2_ref, o_ref):
    # x_ref:  (B, TF)  lane-dense slab of the input
    # w1_ref: (1, TF)  weights slab, broadcasts over the B (sublane) axis
    # w2_ref: (B, TF)  weights2 slab (B == n)
    x = x_ref[...]
    y = jnp.maximum(x * w1_ref[...], 0)          # x * weights ; relu
    o_ref[...] = (y * w2_ref[...]).astype(o_ref.dtype)   # * weights2


def _choose_lane_tile(feat, rows, dtype_bytes, target_block_bytes=1 << 20):
    """Pick a lane-tile that is a multiple of 128 (or the full extent) and keeps a
    (rows, tile) block around ~1 MiB so 2x-buffered operands fit every generation's
    scoped-VMEM default (16 MiB v5e / 32 MiB v6e / 32-of-64 MiB v7x)."""
    if feat <= 128 or feat % 128 != 0:
        return int(feat)                          # full extent (legal block shape)
    lanes = max(128, target_block_bytes // max(1, rows * dtype_bytes))
    lanes = (lanes // 128) * 128
    return int(min(feat, lanes))


def trainable_eltwise_forward(x, weights, weights2):
    B, n, h, w = x.shape
    assert B == n, "broadcasting in `x * weights2` requires batch == n"
    assert weights.shape == (1, n, h, w)
    assert weights2.shape == (n, n, h, w)

    feat = n * h * w
    dtype_bytes = jnp.dtype(x.dtype).itemsize

    # Pure layout plumbing: contiguous reshapes to a lane-dense 2D view.
    x2 = x.reshape(B, feat)
    w1_2 = weights.reshape(1, feat)
    w2_2 = weights2.reshape(n, feat)

    tf = _choose_lane_tile(feat, B, dtype_bytes)
    grid = (pl.cdiv(feat, tf),)

    bytes_accessed = (2 * x2.size + w1_2.size + w2_2.size) * dtype_bytes
    cost = pl.CostEstimate(
        flops=3 * B * feat,            # mul + relu + mul per element
        transcendentals=0,
        bytes_accessed=bytes_accessed,
    )

    out2 = pl.pallas_call(
        _eltwise_kernel,
        out_shape=jax.ShapeDtypeStruct((B, feat), x.dtype),
        grid=grid,
        in_specs=[
            pl.BlockSpec((B, tf), lambda j: (0, j)),   # x     : contiguous slab
            pl.BlockSpec((1, tf), lambda j: (0, j)),   # weights (broadcast in-kernel)
            pl.BlockSpec((n, tf), lambda j: (0, j)),   # weights2
        ],
        out_specs=pl.BlockSpec((B, tf), lambda j: (0, j)),  # lane-dense stores
        compiler_params=pltpu.CompilerParams(
            dimension_semantics=("parallel",),   # shards across TCs on v7x
        ),
        cost_estimate=cost,
    )(x2, w1_2, w2_2)

    return out2.reshape(B, n, h, w)


if __name__ == "__main__":
    # Small shapes consistent with the module: n = 4 channels, 16x16 spatial.
    # Batch must equal n (required by `x * weights2` broadcasting in the module).
    B = n = 4
    h = w = 16

    key = jax.random.PRNGKey(0)
    kx, k1, k2 = jax.random.split(key, 3)
    x = jax.random.normal(kx, (B, n, h, w), dtype=jnp.float32)
    # nn.Parameter(torch.Tensor(...)) is uninitialized memory in PyTorch, so any
    # deterministic init is acceptable for the parameters.
    weights = jax.random.normal(k1, (1, n, h, w), dtype=jnp.float32)
    weights2 = jax.random.normal(k2, (n, n, h, w), dtype=jnp.float32)

    out = trainable_eltwise_forward(x, weights, weights2)
    out = jax.block_until_ready(out)

    # Reference in plain JAX (same broadcasting semantics as PyTorch).
    ref = jnp.maximum(x * weights, 0.0) * weights2
    assert out.shape == (B, n, h, w)
    assert jnp.allclose(out, ref, atol=1e-6, rtol=1e-6)

    print("KERNEL_OK")
</pallas_src>

<mosaic_0001>
module attributes {stable_mosaic.version = 11 : i64} {
  func.func @_eltwise_kernel(%arg0: i32, %arg1: memref<4x1024xf32, #tpu.memory_space<vmem>>, %arg2: memref<1x1024xf32, #tpu.memory_space<vmem>>, %arg3: memref<4x1024xf32, #tpu.memory_space<vmem>>, %arg4: memref<4x1024xf32, #tpu.memory_space<vmem>>) attributes {dimension_semantics = [#tpu.dimension_semantics<parallel>], iteration_bounds = array<i64: 1>, scalar_prefetch = 0 : i64, scratch_operands = 0 : i64, tpu.core_type = #tpu.core_type<tc>, window_params = [{transform_indices = @transform_0, window_bounds = array<i64: 4, 1024>}, {transform_indices = @transform_1, window_bounds = array<i64: 1, 1024>}, {transform_indices = @transform_2, window_bounds = array<i64: 4, 1024>}, {transform_indices = @transform_3, window_bounds = array<i64: 4, 1024>}]} {
    %c0 = arith.constant 0 : index
    %c0_0 = arith.constant 0 : index
    %0 = vector.load %arg1[%c0, %c0_0] : memref<4x1024xf32, #tpu.memory_space<vmem>>, vector<4x1024xf32>
    %c0_1 = arith.constant 0 : index
    %c0_2 = arith.constant 0 : index
    %1 = vector.load %arg2[%c0_1, %c0_2] : memref<1x1024xf32, #tpu.memory_space<vmem>>, vector<1x1024xf32>
    %2 = vector.broadcast %1 : vector<1x1024xf32> to vector<4x1024xf32>
    %3 = arith.mulf %0, %2 : vector<4x1024xf32>
    %cst = arith.constant 0.000000e+00 : f32
    %4 = vector.broadcast %cst : f32 to vector<4x1024xf32>
    %5 = arith.maximumf %3, %4 : vector<4x1024xf32>
    %c0_3 = arith.constant 0 : index
    %c0_4 = arith.constant 0 : index
    %6 = vector.load %arg3[%c0_3, %c0_4] : memref<4x1024xf32, #tpu.memory_space<vmem>>, vector<4x1024xf32>
    %7 = arith.mulf %5, %6 : vector<4x1024xf32>
    %c0_5 = arith.constant 0 : index
    %c0_6 = arith.constant 0 : index
    %8 = vector.load %arg4[%c0_5, %c0_6] : memref<4x1024xf32, #tpu.memory_space<vmem>>, vector<4x1024xf32>
    tpu.vector_store %arg4[%c0_5, %c0_6], %7 {strides = array<i32>} : memref<4x1024xf32, #tpu.memory_space<vmem>>, vector<4x1024xf32>,
    return
  }
  func.func @transform_0(%arg0: i32) -> (i32, i32) {
    %c0_i32 = arith.constant 0 : i32
    %c0_i32_0 = arith.constant 0 : i32
    return %c0_i32, %arg0 : i32, i32
  }
  func.func @transform_1(%arg0: i32) -> (i32, i32) {
    %c0_i32 = arith.constant 0 : i32
    %c0_i32_0 = arith.constant 0 : i32
    return %c0_i32, %arg0 : i32, i32
  }
  func.func @transform_2(%arg0: i32) -> (i32, i32) {
    %c0_i32 = arith.constant 0 : i32
    %c0_i32_0 = arith.constant 0 : i32
    return %c0_i32, %arg0 : i32, i32
  }
  func.func @transform_3(%arg0: i32) -> (i32, i32) {
    %c0_i32 = arith.constant 0 : i32
    %c0_i32_0 = arith.constant 0 : i32
    return %c0_i32, %arg0 : i32, i32
  }
}

</mosaic_0001>

<bundles_post_ra>
// kernel: tpu_custom_call.1
= control target key start
LH: loop header
LB: loop body
LE: loop exit
PB: predicated region body
PF: predicated region fallthrough
CT: control target
= control target key end

     0   :  { %8 = vsyncpa [#allocation3], 0  ;;  %s302_s0 = inlined_call_operand.hbm [shape: f32[4,1024], index: 0, kind: input, shape index: {}]   ;;  %s303_s1 = inlined_call_operand.hbm [shape: f32[1,1024], index: 1, kind: input, shape index: {}]   ;;  %s304_s2 = inlined_call_operand.hbm [shape: f32[4,1024], index: 2, kind: input, shape index: {}]   ;;  %s305_s3 = inlined_call_operand.hbm [shape: f32[4,1024], index: 3, kind: output, shape index: {}]  }
   0x1   :  { %9 = vsyncpa [#allocation6], 0 }
   0x2   :  { %10 = vsyncpa [#allocation4], 0  ;;  %s230_s12 = smov [#allocation5]   ;;  %s231_s14 = smov [#allocation2]  }
   0x3   :  { %s27_s13 = sshll.u32 %s230_s12, 4  ;;  %s17_s15 = sshll.u32 %s231_s14, 4  ;;  %s28_s13 = int_to_ptr.vmem [resolvable:$true] %s27_s13  ;;  %s18_s15 = int_to_ptr.vmem [resolvable:$true] %s17_s15 }
   0x4   :  { %s136_s18 = scalar_lea.hbm %s303_s1, 128 }
   0x5   :  { %p137_p0 = scmp.ne.s32.totalorder %s303_s1, %s136_s18  ;;  %p140_p1 = scmp.lt.u32.totalorder %s136_s18, %s303_s1 }
   0x7   :  { %p142_p2 = pnand %p140_p1, %p137_p0 }
   0x9   :  { %145 = shalt.err (!%p142_p2)
}
   0xa   :  { %s146_s23 = scalar_lea.vmem %s28_s13, 128  ;;  %p151_p4 = scmp.lt.s32.totalorder %s28_s13, %s28_s13 }
   0xb   :  { %p147_p3 = scmp.ne.s32.totalorder %s28_s13, %s146_s23  ;;  %p152_p5 = scmp.lt.s32.totalorder %s146_s23, %s146_s23 }
   0xd   :  { %p153_p6 = por %p152_p5, %p151_p4 }
   0xf   :  { %p154_p7 = pnand %p153_p6, %p147_p3 }
  0x11   :  { %157 = shalt.err (!%p154_p7)
}
  0x12   :  { %30 = dma.hbm_to_vmem [thread:$0]  %s303_s1, 128, %s28_s13, [#allocation6]  }
  0x13   :  { %s158_s28 = scalar_lea.hbm %s302_s0, 512 }
  0x14   :  { %p159_p8 = scmp.ne.s32.totalorder %s302_s0, %s158_s28  ;;  %p162_p9 = scmp.lt.u32.totalorder %s158_s28, %s302_s0 }
  0x16   :  { %p164_p10 = pnand %p162_p9, %p159_p8 }
  0x18   :  { %167 = shalt.err (!%p164_p10)
}
  0x19   :  { %s168_s6 = scalar_lea.vmem %s18_s15, 512  ;;  %p173_p12 = scmp.lt.s32.totalorder %s18_s15, %s18_s15 }
  0x1a   :  { %p169_p11 = scmp.ne.s32.totalorder %s18_s15, %s168_s6  ;;  %p174_p13 = scmp.lt.s32.totalorder %s168_s6, %s168_s6 }
  0x1c   :  { %p175_p0 = por %p174_p13, %p173_p12 }
  0x1e   :  { %p176_p1 = pnand %p175_p0, %p169_p11 }
  0x20   :  { %179 = shalt.err (!%p176_p1)
}
  0x21   :  { %20 = dma.hbm_to_vmem [thread:$0]  %s302_s0, 512, %s18_s15, [#allocation3]  }
  0x22   :  { %s232_s8 = smov [#allocation7]   ;;  %s180_s12 = scalar_lea.hbm %s304_s2, 512 }
  0x23   :  { %s37_s9 = sshll.u32 %s232_s8, 4  ;;  %p181_p2 = scmp.ne.s32.totalorder %s304_s2, %s180_s12  ;;  %s38_s9 = int_to_ptr.vmem [resolvable:$true] %s37_s9 }
  0x24   :  { %p184_p3 = scmp.lt.u32.totalorder %s180_s12, %s304_s2 }
  0x26   :  { %p186_p4 = pnand %p184_p3, %p181_p2 }
  0x28   :  { %189 = shalt.err (!%p186_p4)
}
  0x29   :  { %s190_s18 = scalar_lea.vmem %s38_s9, 512  ;;  %p195_p6 = scmp.lt.s32.totalorder %s38_s9, %s38_s9 }
  0x2a   :  { %p191_p5 = scmp.ne.s32.totalorder %s38_s9, %s190_s18  ;;  %p196_p7 = scmp.lt.s32.totalorder %s190_s18, %s190_s18 }
  0x2c   :  { %p197_p8 = por %p196_p7, %p195_p6 }
  0x2e   :  { %p198_p9 = pnand %p197_p8, %p191_p5 }
  0x30   :  { %201 = shalt.err (!%p198_p9)
}
  0x31   :  { %40 = dma.hbm_to_vmem [thread:$0]  %s304_s2, 512, %s38_s9, [#allocation6]  }
  0x32   :  { %224 = dma.done.wait [#allocation3], 512  }
  0x33   :  { %225 = vsyncadd [#allocation3], 4294966784 }
  0x34   :  { %226 = dma.done.wait [#allocation6], 640  }
  0x35   :  { %227 = vsyncadd [#allocation6], 4294966656  ;;  %v56_v0 = vlaneseq  ;;  %v54_v10 = vld [vmem:[#allocation5] sm:$0xff]  ;;  %v51_v16 = vld [vmem:[#allocation2 + $0x8] sm:$0xff]  ;;  %s233_s2 = smov [#allocation8]  }
  0x36   :  { %v50_v15 = vld [vmem:[#allocation2] sm:$0xff]  ;;  %v52_v23 = vld [vmem:[#allocation2 + $0x10] sm:$0xff]  ;;  %v53_v24 = vld [vmem:[#allocation2 + $0x18] sm:$0xff]  ;;  %s122_s19 = sshll.u32 %s233_s2, 4  ;;  %s123_s19 = int_to_ptr.vmem [resolvable:$true] %s122_s19 }
  0x37   :  { %v57_v1 = vshrl.u32 %v56_v0, 7  ;;  %v104_v29 = vld [vmem:[#allocation7] sm:$0xff]  ;;  %v105_v30 = vld [vmem:[#allocation7 + $0x8] sm:$0xff]  ;;  %v106_v35 = vld [vmem:[#allocation7 + $0x10] sm:$0xff]  ;;  %s202_s20 = scalar_lea.vmem %s123_s19, 512  ;;  %p207_p11 = scmp.lt.s32.totalorder %s123_s19, %s123_s19 }
  0x38   :  { %v107_v36 = vld [vmem:[#allocation7 + $0x18] sm:$0xff]  ;;  %p203_p10 = scmp.ne.s32.totalorder %s123_s19, %s202_s20  ;;  %p208_p12 = scmp.lt.s32.totalorder %s202_s20, %s202_s20 }
  0x39   :  { %v58_v2 = vsub.s32 0, %v57_v1  ;;  %v62_v3 = vsub.s32 1, %v57_v1  ;;  %v66_v4 = vsub.s32 2, %v57_v1  ;;  %v70_v5 = vsub.s32 3, %v57_v1 }
  0x3a   :  { %v74_v6 = vsub.s32 4, %v57_v1  ;;  %v78_v7 = vsub.s32 5, %v57_v1  ;;  %v82_v8 = vsub.s32 6, %v57_v1  ;;  %v86_v9 = vsub.s32 7, %v57_v1  ;;  %p209_p13 = por %p208_p12, %p207_p11 }
  0x3b   :  { %v59_v11 = vrot.slane %v54_v10, %v58_v2  ;;  %v63_v12 = vrot.slane %v54_v10, %v62_v3  ;;  %v67_v13 = vrot.slane %v54_v10, %v66_v4  ;;  %v71_v14 = vrot.slane %v54_v10, %v70_v5 }
  0x3c   :  { %v75_v17 = vrot.slane %v54_v10, %v74_v6  ;;  %v79_v18 = vrot.slane %v54_v10, %v78_v7  ;;  %v83_v19 = vrot.slane %v54_v10, %v82_v8  ;;  %v87_v20 = vrot.slane %v54_v10, %v86_v9  ;;  %p210_p0 = pnand %p209_p13, %p203_p10 }
  0x3d   :  { %v88_v21 = vcombine.low %v59_v11, %v63_v12  ;;  %v89_v22 = vcombine.low %v67_v13, %v71_v14 }
  0x3e   :  { %v90_v25 = vcombine.low %v75_v17, %v79_v18  ;;  %v91_v26 = vcombine.low %v83_v19, %v87_v20 }
  0x3f   :  { %v96_v27 = vmul.f32 %v88_v21, %v50_v15  ;;  %v97_v28 = vmul.f32 %v89_v22, %v51_v16 }
  0x40   :  { %v98_v31 = vmul.f32 %v90_v25, %v52_v23  ;;  %v99_v32 = vmul.f32 %v91_v26, %v53_v24 }
  0x41   :  { %v100_v33 = vmax.f32 %v96_v27, 0.0  ;;  %v101_v34 = vmax.f32 %v97_v28, 0.0 }
  0x42   :  { %v102_v37 = vmax.f32 %v98_v31, 0.0  ;;  %v103_v38 = vmax.f32 %v99_v32, 0.0 }
  0x43   :  { %v108_v39 = vmul.f32 %v104_v29, %v100_v33  ;;  %v109_v40 = vmul.f32 %v105_v30, %v101_v34 }
  0x44   :  { %v110_v41 = vmul.f32 %v106_v35, %v102_v37  ;;  %v111_v42 = vmul.f32 %v107_v36, %v103_v38 }
  0x45   :  { %112 = vst [vmem:[#allocation8] sm:$0xff] %v108_v39  ;;  %113 = vst [vmem:[#allocation8 + $0x8] sm:$0xff] %v109_v40 }
  0x46   :  { %114 = vst [vmem:[#allocation8 + $0x10] sm:$0xff] %v110_v41  ;;  %115 = vst [vmem:[#allocation8 + $0x18] sm:$0xff] %v111_v42 }
  0x47   :  { %213 = shalt.err (!%p210_p0)
}
  0x48   :  { %s214_s23 = scalar_lea.hbm %s305_s3, 512 }
  0x49   :  { %p215_p1 = scmp.ne.s32.totalorder %s305_s3, %s214_s23  ;;  %p218_p2 = scmp.lt.u32.totalorder %s214_s23, %s305_s3 }
  0x4b   :  { %p220_p3 = pnand %p218_p2, %p215_p1 }
  0x4d   :  { %223 = shalt.err (!%p220_p3)
}
  0x4e   :  { %125 = dma.vmem_to_hbm [thread:$0]  %s123_s19, 512, %s305_s3, [#allocation4]  }
  0x4f   :  { %228 = dma.done.wait [#allocation4], 512  }
  0x50   :  { %229 = vsyncadd [#allocation4], 4294966784 }
  0x51   :  { %129 = vsyncpa [#allocation3], 1 }
  0x52   :  { %130 = vsyncpa [#allocation6], 1 }
  0x53   :  { %131 = vsyncpa [#allocation4], 1 }

</bundles_post_ra>
